<compile_context>
chip_gen: v5e
topology: v5e:2x2
jax: 0.10.0
libtpu: 0.0.40
codegen_flags: <defaults>
</compile_context>

<pallas_src>
import jax
import jax.numpy as jnp
from jax.experimental import pallas as pl
from jax.experimental.pallas import tpu as pltpu


K1_PAD = 16   # layer-1 contraction dim padded 10 -> 16 (sublane layout hygiene)
LANE = 128    # TPU lane width; batch (lane) tiles are multiples of this


def mlp_kernel_t(x_ref, w1_ref, b1_ref, w2_ref, b2_ref, w3_ref, b3_ref,
                 w4_ref, b4_ref, o_ref):
    """One batch tile of the fused MLP, batch on lanes.

    Shapes (per tile): x^T (16, T), h1^T (256, T), h2^T (128, T),
    h3^T (64, T), output (1, T).  Every matmul output is lane-dense.
    """
    # Layer 1: h1^T = W1^T @ x^T  -> (256, T).  Kept in f32 (K=16, cheap).
    h = jnp.dot(w1_ref[...], x_ref[...], preferred_element_type=jnp.float32)
    h = jnp.maximum(h + b1_ref[...], 0.0)

    # Layer 2: (128, 256) bf16 @ (256, T) bf16 -> (128, T) f32
    h = jnp.dot(w2_ref[...], h.astype(jnp.bfloat16),
                preferred_element_type=jnp.float32)
    h = jnp.maximum(h + b2_ref[...], 0.0)

    # Layer 3: (64, 128) bf16 @ (128, T) bf16 -> (64, T) f32
    h = jnp.dot(w3_ref[...], h.astype(jnp.bfloat16),
                preferred_element_type=jnp.float32)
    h = jnp.maximum(h + b3_ref[...], 0.0)

    # Layer 4: Linear(64, 1) + Sigmoid.  N=1 would waste the MXU, so do a VPU
    # multiply + sublane (XLU) reduction; result row is lane-dense (1, T).
    logit = jnp.sum(h * w4_ref[...], axis=0, keepdims=True) + b4_ref[...]
    o_ref[...] = jax.nn.sigmoid(logit)


def _round_up(n, m):
    return (n + m - 1) // m * m


def _choose_tile_b(B):
    """Batch (lane) tile size: large tiles for big B, always >= 2 tiles once
    B >= 1024 so v7x's second TensorCore isn't idle."""
    if B <= 1024:
        return _round_up(B, LANE)                 # single tile
    half = _round_up((B + 1) // 2, LANE)
    return min(2048, half)                        # >= 2 tiles, <= 2048 rows


def prepare_params(params):
    """Cast / pad / transpose [in,out]-layout params into kernel operands."""
    w1 = jnp.zeros((K1_PAD, 256), jnp.float32)
    w1 = w1.at[:10, :].set(params["w1"].astype(jnp.float32))
    return {
        "w1t": w1.T,                                               # (256, 16) f32
        "b1": params["b1"].astype(jnp.float32).reshape(256, 1),
        "w2t": params["w2"].astype(jnp.bfloat16).T,                # (128, 256) bf16
        "b2": params["b2"].astype(jnp.float32).reshape(128, 1),
        "w3t": params["w3"].astype(jnp.bfloat16).T,                # (64, 128) bf16
        "b3": params["b3"].astype(jnp.float32).reshape(64, 1),
        "w4c": params["w4"].astype(jnp.float32).reshape(64, 1),    # layer-4 column
        "b4": params["b4"].astype(jnp.float32).reshape(1, 1),
    }


def simple_model_forward(x, params, tile_b=None):
    """x: [B, 10] float32. params: dict with w_i [in,out], b_i [1,out]."""
    B, F = x.shape
    if tile_b is None:
        tile_b = _choose_tile_b(B)
    tile_b = _round_up(tile_b, LANE)
    b_pad = _round_up(B, tile_b)

    # Batch-on-lanes operand: pad features 10 -> 16 and batch to a tile
    # multiple, then transpose (fused by XLA into the pad; no extra HBM pass).
    x_t = jnp.pad(x.astype(jnp.float32),
                  ((0, b_pad - B), (0, K1_PAD - F))).T        # (16, b_pad) f32

    p = prepare_params(params)
    grid = (b_pad // tile_b,)

    const = lambda i: (0, 0)   # weights/biases stay resident across batch tiles
    in_specs = [
        pl.BlockSpec((K1_PAD, tile_b), lambda i: (0, i)),     # x^T tile
        pl.BlockSpec((256, K1_PAD), const),                   # w1^T
        pl.BlockSpec((256, 1), const),                        # b1
        pl.BlockSpec((128, 256), const),                      # w2^T
        pl.BlockSpec((128, 1), const),                        # b2
        pl.BlockSpec((64, 128), const),                       # w3^T
        pl.BlockSpec((64, 1), const),                         # b3
        pl.BlockSpec((64, 1), const),                         # w4 column
        pl.BlockSpec((1, 1), const),                          # b4
    ]
    out_spec = pl.BlockSpec((1, tile_b), lambda i: (0, i))    # lane-dense output

    flops = 2 * b_pad * (K1_PAD * 256 + 256 * 128 + 128 * 64 + 64)
    bytes_accessed = (x_t.size * 4 + b_pad * 4
                      + sum(int(v.size) * v.dtype.itemsize for v in p.values()))
    cost = pl.CostEstimate(flops=flops, transcendentals=b_pad,
                           bytes_accessed=bytes_accessed)

    out = pl.pallas_call(
        mlp_kernel_t,
        out_shape=jax.ShapeDtypeStruct((1, b_pad), jnp.float32),
        grid=grid,
        in_specs=in_specs,
        out_specs=out_spec,
        compiler_params=pltpu.CompilerParams(
            dimension_semantics=("parallel",),      # megacore sharding on v7x
            vmem_limit_bytes=32 * 1024 * 1024,      # headroom for TILE_B=2048 (v5e)
        ),
        cost_estimate=cost,
    )(x_t, p["w1t"], p["b1"], p["w2t"], p["b2"], p["w3t"], p["b3"],
      p["w4c"], p["b4"])

    return out[0, :B].reshape(B, 1)


def init_params(key):
    """Deterministic init mirroring nn.Linear default (uniform(+-1/sqrt(fan_in)))."""
    dims = [(10, 256), (256, 128), (128, 64), (64, 1)]
    params = {}
    for i, (fan_in, fan_out) in enumerate(dims, start=1):
        key, kw, kb = jax.random.split(key, 3)
        bound = 1.0 / jnp.sqrt(float(fan_in))
        params[f"w{i}"] = jax.random.uniform(
            kw, (fan_in, fan_out), jnp.float32, minval=-bound, maxval=bound)
        params[f"b{i}"] = jax.random.uniform(
            kb, (1, fan_out), jnp.float32, minval=-bound, maxval=bound)
    return params


def reference_forward_f32(x, params):
    hp = jax.lax.Precision.HIGHEST
    h = jnp.maximum(jnp.dot(x, params["w1"], precision=hp) + params["b1"], 0.0)
    h = jnp.maximum(jnp.dot(h, params["w2"], precision=hp) + params["b2"], 0.0)
    h = jnp.maximum(jnp.dot(h, params["w3"], precision=hp) + params["b3"], 0.0)
    return jax.nn.sigmoid(jnp.dot(h, params["w4"], precision=hp) + params["b4"])


def reference_forward_matched(x, params):
    """Same recipe as the kernel: f32 layer 1, bf16-operand layers 2-3."""
    hp = jax.lax.Precision.HIGHEST

    def mm_bf16(a, w):
        return jnp.dot(a.astype(jnp.bfloat16), w.astype(jnp.bfloat16),
                       preferred_element_type=jnp.float32)

    h = jnp.maximum(jnp.dot(x, params["w1"], precision=hp) + params["b1"], 0.0)
    h = jnp.maximum(mm_bf16(h, params["w2"]) + params["b2"], 0.0)
    h = jnp.maximum(mm_bf16(h, params["w3"]) + params["b3"], 0.0)
    return jax.nn.sigmoid(jnp.dot(h, params["w4"], precision=hp) + params["b4"])


if __name__ == "__main__":
    key = jax.random.PRNGKey(0)
    key, kx1, kx2 = jax.random.split(key, 3)
    params = init_params(key)

    # Small primary check (single tile).
    batch = 8
    x = jax.random.normal(kx1, (batch, 10), dtype=jnp.float32)
    out = jax.block_until_ready(simple_model_forward(x, params))
    assert out.shape == (batch, 1)
    assert jnp.allclose(out, reference_forward_matched(x, params),
                        atol=1e-2, rtol=1e-2), "mismatch vs matched reference"
    assert jnp.allclose(out, reference_forward_f32(x, params),
                        atol=2e-2, rtol=2e-2), "mismatch vs f32 reference"

    # Multi-tile check: exercises batch padding, the tiled x/output index_maps
    # and resident weights across grid steps (B=300, tile=128 -> grid=(3,)).
    x2 = jax.random.normal(kx2, (300, 10), dtype=jnp.float32)
    out2 = jax.block_until_ready(simple_model_forward(x2, params, tile_b=128))
    assert out2.shape == (300, 1)
    assert jnp.allclose(out2, reference_forward_f32(x2, params),
                        atol=2e-2, rtol=2e-2), "multi-tile mismatch vs f32 ref"

    print("KERNEL_OK")
</pallas_src>

<mosaic_0001>
module attributes {stable_mosaic.version = 11 : i64} {
  func.func @mlp_kernel_t(%arg0: i32, %arg1: memref<16x128xf32, #tpu.memory_space<vmem>>, %arg2: memref<256x16xf32, #tpu.memory_space<vmem>>, %arg3: memref<256x1xf32, #tpu.memory_space<vmem>>, %arg4: memref<128x256xbf16, #tpu.memory_space<vmem>>, %arg5: memref<128x1xf32, #tpu.memory_space<vmem>>, %arg6: memref<64x128xbf16, #tpu.memory_space<vmem>>, %arg7: memref<64x1xf32, #tpu.memory_space<vmem>>, %arg8: memref<64x1xf32, #tpu.memory_space<vmem>>, %arg9: memref<1x1xf32, #tpu.memory_space<vmem>>, %arg10: memref<1x128xf32, #tpu.memory_space<vmem>>) attributes {dimension_semantics = [#tpu.dimension_semantics<parallel>], iteration_bounds = array<i64: 1>, scalar_prefetch = 0 : i64, scratch_operands = 0 : i64, tpu.core_type = #tpu.core_type<tc>, window_params = [{transform_indices = @transform_0, window_bounds = array<i64: 16, 128>}, {pipeline_mode = #tpu.pipeline_mode<synchronous>, transform_indices = @transform_1, window_bounds = array<i64: 256, 16>}, {pipeline_mode = #tpu.pipeline_mode<synchronous>, transform_indices = @transform_2, window_bounds = array<i64: 256, 1>}, {pipeline_mode = #tpu.pipeline_mode<synchronous>, transform_indices = @transform_3, window_bounds = array<i64: 128, 256>}, {pipeline_mode = #tpu.pipeline_mode<synchronous>, transform_indices = @transform_4, window_bounds = array<i64: 128, 1>}, {pipeline_mode = #tpu.pipeline_mode<synchronous>, transform_indices = @transform_5, window_bounds = array<i64: 64, 128>}, {pipeline_mode = #tpu.pipeline_mode<synchronous>, transform_indices = @transform_6, window_bounds = array<i64: 64, 1>}, {pipeline_mode = #tpu.pipeline_mode<synchronous>, transform_indices = @transform_7, window_bounds = array<i64: 64, 1>}, {pipeline_mode = #tpu.pipeline_mode<synchronous>, transform_indices = @transform_8, window_bounds = array<i64: 1, 1>}, {transform_indices = @transform_9, window_bounds = array<i64: 1, 128>}]} {
    %c0 = arith.constant 0 : index
    %c0_0 = arith.constant 0 : index
    %0 = vector.load %arg2[%c0, %c0_0] : memref<256x16xf32, #tpu.memory_space<vmem>>, vector<256x16xf32>
    %c0_1 = arith.constant 0 : index
    %c0_2 = arith.constant 0 : index
    %1 = vector.load %arg1[%c0_1, %c0_2] : memref<16x128xf32, #tpu.memory_space<vmem>>, vector<16x128xf32>
    %cst = arith.constant dense<0.000000e+00> : vector<256x128xf32>
    %2 = tpu.matmul %0, %1, %cst {dimension_numbers = #tpu.dot_dimension_numbers<[1], [0], [0], [1], [0, 0, 1, 1], [], []>} : vector<256x16xf32>, vector<16x128xf32>, vector<256x128xf32> -> vector<256x128xf32>
    %c0_3 = arith.constant 0 : index
    %c0_4 = arith.constant 0 : index
    %3 = vector.load %arg3[%c0_3, %c0_4] : memref<256x1xf32, #tpu.memory_space<vmem>>, vector<256x1xf32>
    %4 = vector.broadcast %3 : vector<256x1xf32> to vector<256x128xf32>
    %5 = arith.addf %2, %4 : vector<256x128xf32>
    %cst_5 = arith.constant 0.000000e+00 : f32
    %6 = vector.broadcast %cst_5 : f32 to vector<256x128xf32>
    %7 = arith.maximumf %5, %6 : vector<256x128xf32>
    %c0_6 = arith.constant 0 : index
    %c0_7 = arith.constant 0 : index
    %8 = vector.load %arg4[%c0_6, %c0_7] : memref<128x256xbf16, #tpu.memory_space<vmem>>, vector<128x256xbf16>
    %9 = arith.truncf %7 : vector<256x128xf32> to vector<256x128xbf16>
    %cst_8 = arith.constant dense<0.000000e+00> : vector<128x128xf32>
    %10 = tpu.matmul %8, %9, %cst_8 {dimension_numbers = #tpu.dot_dimension_numbers<[1], [0], [0], [1], [0, 0, 1, 1], [], []>} : vector<128x256xbf16>, vector<256x128xbf16>, vector<128x128xf32> -> vector<128x128xf32>
    %c0_9 = arith.constant 0 : index
    %c0_10 = arith.constant 0 : index
    %11 = vector.load %arg5[%c0_9, %c0_10] : memref<128x1xf32, #tpu.memory_space<vmem>>, vector<128x1xf32>
    %12 = vector.broadcast %11 : vector<128x1xf32> to vector<128x128xf32>
    %13 = arith.addf %10, %12 : vector<128x128xf32>
    %cst_11 = arith.constant 0.000000e+00 : f32
    %14 = vector.broadcast %cst_11 : f32 to vector<128x128xf32>
    %15 = arith.maximumf %13, %14 : vector<128x128xf32>
    %c0_12 = arith.constant 0 : index
    %c0_13 = arith.constant 0 : index
    %16 = vector.load %arg6[%c0_12, %c0_13] : memref<64x128xbf16, #tpu.memory_space<vmem>>, vector<64x128xbf16>
    %17 = arith.truncf %15 : vector<128x128xf32> to vector<128x128xbf16>
    %cst_14 = arith.constant dense<0.000000e+00> : vector<64x128xf32>
    %18 = tpu.matmul %16, %17, %cst_14 {dimension_numbers = #tpu.dot_dimension_numbers<[1], [0], [0], [1], [0, 0, 1, 1], [], []>} : vector<64x128xbf16>, vector<128x128xbf16>, vector<64x128xf32> -> vector<64x128xf32>
    %c0_15 = arith.constant 0 : index
    %c0_16 = arith.constant 0 : index
    %19 = vector.load %arg7[%c0_15, %c0_16] : memref<64x1xf32, #tpu.memory_space<vmem>>, vector<64x1xf32>
    %20 = vector.broadcast %19 : vector<64x1xf32> to vector<64x128xf32>
    %21 = arith.addf %18, %20 : vector<64x128xf32>
    %cst_17 = arith.constant 0.000000e+00 : f32
    %22 = vector.broadcast %cst_17 : f32 to vector<64x128xf32>
    %23 = arith.maximumf %21, %22 : vector<64x128xf32>
    %c0_18 = arith.constant 0 : index
    %c0_19 = arith.constant 0 : index
    %24 = vector.load %arg8[%c0_18, %c0_19] : memref<64x1xf32, #tpu.memory_space<vmem>>, vector<64x1xf32>
    %25 = vector.broadcast %24 : vector<64x1xf32> to vector<64x128xf32>
    %26 = arith.mulf %23, %25 : vector<64x128xf32>
    %cst_20 = arith.constant dense<0.000000e+00> : vector<128xf32>
    %27 = vector.multi_reduction <add>, %26, %cst_20 [0] : vector<64x128xf32> to vector<128xf32>
    %28 = vector.shape_cast %27 : vector<128xf32> to vector<1x128xf32>
    %c0_21 = arith.constant 0 : index
    %c0_22 = arith.constant 0 : index
    %29 = vector.load %arg9[%c0_21, %c0_22] : memref<1x1xf32, #tpu.memory_space<vmem>>, vector<1x1xf32>
    %30 = vector.broadcast %29 : vector<1x1xf32> to vector<1x128xf32>
    %31 = arith.addf %28, %30 : vector<1x128xf32>
    %32 = arith.negf %31 : vector<1x128xf32>
    %33 = math.exp %32 : vector<1x128xf32>
    %cst_23 = arith.constant 1.000000e+00 : f32
    %34 = vector.broadcast %cst_23 : f32 to vector<1x128xf32>
    %35 = arith.addf %34, %33 : vector<1x128xf32>
    %36 = arith.divf %34, %35 : vector<1x128xf32>
    %c0_24 = arith.constant 0 : index
    %c0_25 = arith.constant 0 : index
    %37 = vector.load %arg10[%c0_24, %c0_25] : memref<1x128xf32, #tpu.memory_space<vmem>>, vector<1x128xf32>
    tpu.vector_store %arg10[%c0_24, %c0_25], %36 {strides = array<i32>} : memref<1x128xf32, #tpu.memory_space<vmem>>, vector<1x128xf32>,
    return
  }
  func.func @transform_0(%arg0: i32) -> (i32, i32) {
    %c0_i32 = arith.constant 0 : i32
    %c0_i32_0 = arith.constant 0 : i32
    return %c0_i32, %arg0 : i32, i32
  }
  func.func @transform_1(%arg0: i32) -> (i32, i32) {
    %c0_i32 = arith.constant 0 : i32
    %c0_i32_0 = arith.constant 0 : i32
    %c0_i32_1 = arith.constant 0 : i32
    return %c0_i32, %c0_i32_0 : i32, i32
  }
  func.func @transform_2(%arg0: i32) -> (i32, i32) {
    %c0_i32 = arith.constant 0 : i32
    %c0_i32_0 = arith.constant 0 : i32
    %c0_i32_1 = arith.constant 0 : i32
    return %c0_i32, %c0_i32_0 : i32, i32
  }
  func.func @transform_3(%arg0: i32) -> (i32, i32) {
    %c0_i32 = arith.constant 0 : i32
    %c0_i32_0 = arith.constant 0 : i32
    %c0_i32_1 = arith.constant 0 : i32
    return %c0_i32, %c0_i32_0 : i32, i32
  }
  func.func @transform_4(%arg0: i32) -> (i32, i32) {
    %c0_i32 = arith.constant 0 : i32
    %c0_i32_0 = arith.constant 0 : i32
    %c0_i32_1 = arith.constant 0 : i32
    return %c0_i32, %c0_i32_0 : i32, i32
  }
  func.func @transform_5(%arg0: i32) -> (i32, i32) {
    %c0_i32 = arith.constant 0 : i32
    %c0_i32_0 = arith.constant 0 : i32
    %c0_i32_1 = arith.constant 0 : i32
    return %c0_i32, %c0_i32_0 : i32, i32
  }
  func.func @transform_6(%arg0: i32) -> (i32, i32) {
    %c0_i32 = arith.constant 0 : i32
    %c0_i32_0 = arith.constant 0 : i32
    %c0_i32_1 = arith.constant 0 : i32
    return %c0_i32, %c0_i32_0 : i32, i32
  }
  func.func @transform_7(%arg0: i32) -> (i32, i32) {
    %c0_i32 = arith.constant 0 : i32
    %c0_i32_0 = arith.constant 0 : i32
    %c0_i32_1 = arith.constant 0 : i32
    return %c0_i32, %c0_i32_0 : i32, i32
  }
  func.func @transform_8(%arg0: i32) -> (i32, i32) {
    %c0_i32 = arith.constant 0 : i32
    %c0_i32_0 = arith.constant 0 : i32
    %c0_i32_1 = arith.constant 0 : i32
    return %c0_i32, %c0_i32_0 : i32, i32
  }
  func.func @transform_9(%arg0: i32) -> (i32, i32) {
    %c0_i32 = arith.constant 0 : i32
    %c0_i32_0 = arith.constant 0 : i32
    return %c0_i32, %arg0 : i32, i32
  }
}

</mosaic_0001>

<bundles_post_ra>
// kernel: tpu_custom_call.1
= control target key start
LH: loop header
LB: loop body
LE: loop exit
PB: predicated region body
PF: predicated region fallthrough
CT: control target
= control target key end

     0   :  { %s1839_s0 = inlined_call_operand.vmem [shape: f32[16,128], index: 0, kind: input, shape index: {}]   ;;  %s1840_s1 = inlined_call_operand.vmem [shape: f32[256,16], index: 1, kind: input, shape index: {}]   ;;  %s1841_s2 = inlined_call_operand.vmem [shape: f32[256,1], index: 2, kind: input, shape index: {}]   ;;  %s1842_s3 = inlined_call_operand.vmem [shape: bf16[128,256], index: 3, kind: input, shape index: {}]   ;;  %s1843_s4 = inlined_call_operand.vmem [shape: f32[128,1], index: 4, kind: input, shape index: {}]   ;;  %s1844_s5 = inlined_call_operand.vmem [shape: bf16[64,128], index: 5, kind: input, shape index: {}]   ;;  %s1845_s6 = inlined_call_operand.vmem [shape: f32[64,1], index: 6, kind: input, shape index: {}]   ;;  %s1846_s7 = inlined_call_operand.vmem [shape: f32[64,1], index: 7, kind: input, shape index: {}]   ;;  %s1847_s8 = inlined_call_operand.<no memory space> [shape: f32[1,1], index: 8, kind: input, shape index: {}]   ;;  %s1848_s9 = inlined_call_operand.hbm [shape: f32[1,128], index: 9, kind: output, shape index: {}]  }
   0x1   :  { %v14_v0 = vstv %s1847_s8 }
   0x2   :  { %15 = vst [vmem:[#allocation2] sm:$0x1] %v14_v0 }
   0x3   :  { %v68_v1 = vld [vmem:[%s1839_s0 + $0x8] sm:$0xff]  ;;  %v99_v2 = vld [vmem:[%s1841_s2 + $0xf0] sm:$0xff]  ;;  %v1233_v3 = vmov 0   ;;  %v97_v4 = vld [vmem:[%s1841_s2 + $0xe0] sm:$0xff]  ;;  %vm261_vm0 = vcmask 130048  }
   0x4   :  { %1202 = vset.pattern.permute.xlu2 %v1233_v3  ;;  %1201 = vset.pattern.permute.xlu1 %v1233_v3  ;;  %v83_v5 = vld [vmem:[%s1841_s2 + $0x70] sm:$0xff]  ;;  %v67_v6 = vld [vmem:[%s1839_s0] sm:$0xff]  ;;  %v100_v9 = vld [vmem:[%s1841_s2 + $0xf8] sm:$0xff] }
   0x5   :  { %1200 = vset.pattern.permute.xlu0 %v1233_v3  ;;  %372 = vmatpush.msra.mxu0 %v68_v1  ;;  %v35_v7 = vld [vmem:[%s1840_s1] sm:$0xff]  ;;  %v98_v10 = vld [vmem:[%s1841_s2 + $0xe8] sm:$0xff]  ;;  %v84_v11 = vld [vmem:[%s1841_s2 + $0x78] sm:$0xff] }
   0x6   :  { %1196 = vmatpush.msra.mxu3 %v68_v1  ;;  %253 = vperm.xlu0 %1200, %v99_v2   ;;  %v55_v8 = vld [vmem:[%s1840_s1 + $0xa0] sm:$0xff] }
   0x7   :  { %243 = vperm.xlu2 %1202, %v97_v4   ;;  %173 = vperm.xlu1 %1201, %v83_v5  }
   0x8   :  { %373 = vmatpush.msra.mxu0 %v67_v6  ;;  %1197 = vmatpush.msra.mxu3 %v67_v6 }
   0x9   :  { %1063 = vmatmul.msk.f32.vlgmr.msra.gmra.mxu0 %vm261_vm0, %v35_v7  ;;  %1083 = vmatmul.msk.f32.vlgmr.msra.gmra.mxu3 %vm261_vm0, %v55_v8 }
   0xa   :  { %16 = vsyncpa [#allocation4], 0  ;;  %v36_v12 = vld [vmem:[%s1840_s1 + $0x8] sm:$0xff]  ;;  %v81_v14 = vld [vmem:[%s1841_s2 + $0x60] sm:$0xff]  ;;  %s1054_s29 = sshll.u32 %s1848_s9, 4  ;;  %s1055_s29 = int_to_ptr.hbm [resolvable:$true] %s1054_s29 }
   0xb   :  { %v56_v13 = vld [vmem:[%s1840_s1 + $0xa8] sm:$0xff]  ;;  %v95_v15 = vld [vmem:[%s1841_s2 + $0xd0] sm:$0xff]  ;;  %v96_v19 = vld [vmem:[%s1841_s2 + $0xd8] sm:$0xff] }
   0xc   :  { %v82_v16 = vld [vmem:[%s1841_s2 + $0x68] sm:$0xff]  ;;  %v37_v17 = vld [vmem:[%s1840_s1 + $0x10] sm:$0xff]  ;;  %v80_v20 = vld [vmem:[%s1841_s2 + $0x58] sm:$0xff] }
   0xd   :  { %v57_v18 = vld [vmem:[%s1840_s1 + $0xb0] sm:$0xff]  ;;  %v38_v22 = vld [vmem:[%s1840_s1 + $0x18] sm:$0xff]  ;;  %v93_v24 = vld [vmem:[%s1841_s2 + $0xc0] sm:$0xff] }
   0xe   :  { %258 = vperm.xlu0 %1200, %v100_v9   ;;  %v79_v21 = vld [vmem:[%s1841_s2 + $0x50] sm:$0xff]  ;;  %v58_v23 = vld [vmem:[%s1840_s1 + $0xb8] sm:$0xff]  ;;  %v94_v25 = vld [vmem:[%s1841_s2 + $0xc8] sm:$0xff] }
   0xf   :  { %248 = vperm.xlu2 %1202, %v98_v10   ;;  %178 = vperm.xlu1 %1201, %v84_v11   ;;  %v77_v26 = vld [vmem:[%s1841_s2 + $0x40] sm:$0xff]  ;;  %v78_v29 = vld [vmem:[%s1841_s2 + $0x48] sm:$0xff]  ;;  %v91_v30 = vld [vmem:[%s1841_s2 + $0xb0] sm:$0xff] }
  0x10   :  { %v39_v27 = vld [vmem:[%s1840_s1 + $0x20] sm:$0xff]  ;;  %v92_v31 = vld [vmem:[%s1841_s2 + $0xb8] sm:$0xff]  ;;  %v40_v32 = vld [vmem:[%s1840_s1 + $0x28] sm:$0xff] }
  0x11   :  { %1064 = vmatmul.msk.f32.gmra.mxu0 %vm261_vm0, %v36_v12  ;;  %1084 = vmatmul.msk.f32.gmra.mxu3 %vm261_vm0, %v56_v13  ;;  %v59_v28 = vld [vmem:[%s1840_s1 + $0xc0] sm:$0xff]  ;;  %v60_v33 = vld [vmem:[%s1840_s1 + $0xc8] sm:$0xff]  ;;  %v75_v34 = vld [vmem:[%s1841_s2 + $0x30] sm:$0xff] }
  0x12   :  { %v89_v35 = vld [vmem:[%s1841_s2 + $0xa0] sm:$0xff]  ;;  %v76_v36 = vld [vmem:[%s1841_s2 + $0x38] sm:$0xff]  ;;  %v41_v37 = vld [vmem:[%s1840_s1 + $0x30] sm:$0xff] }
  0x13   :  { %v61_v38 = vld [vmem:[%s1840_s1 + $0xd0] sm:$0xff]  ;;  %v90_v39 = vld [vmem:[%s1841_s2 + $0xa8] sm:$0xff]  ;;  %v73_v41 = vld [vmem:[%s1841_s2 + $0x20] sm:$0xff] }
  0x14   :  { %v74_v40 = vld [vmem:[%s1841_s2 + $0x28] sm:$0xff]  ;;  %v42_v42 = vld [vmem:[%s1840_s1 + $0x38] sm:$0xff]  ;;  %v87_v44 = vld [vmem:[%s1841_s2 + $0x90] sm:$0xff] }
  0x15   :  { %v62_v43 = vld [vmem:[%s1840_s1 + $0xd8] sm:$0xff]  ;;  %v71_v46 = vld [vmem:[%s1841_s2 + $0x10] sm:$0xff]  ;;  %v43_v47 = vld [vmem:[%s1840_s1 + $0x40] sm:$0xff] }
  0x16   :  { %163 = vperm.xlu0 %1200, %v81_v14   ;;  %v88_v45 = vld [vmem:[%s1841_s2 + $0x98] sm:$0xff]  ;;  %v63_v48 = vld [vmem:[%s1840_s1 + $0xe0] sm:$0xff]  ;;  %v86_v51 = vld [vmem:[%s1841_s2 + $0x88] sm:$0xff] }
  0x17   :  { %233 = vperm.xlu2 %1202, %v95_v15   ;;  %168 = vperm.xlu1 %1201, %v82_v16   ;;  %v72_v49 = vld [vmem:[%s1841_s2 + $0x18] sm:$0xff]  ;;  %v85_v50 = vld [vmem:[%s1841_s2 + $0x80] sm:$0xff]  ;;  %v44_v52 = vld [vmem:[%s1840_s1 + $0x48] sm:$0xff] }
  0x18   :  { %v64_v53 = vld [vmem:[%s1840_s1 + $0xe8] sm:$0xff]  ;;  %v69_v54 = vld [vmem:[%s1841_s2] sm:$0xff]  ;;  %v549_v55 = vld [vmem:[%s1843_s4 + $0x70] sm:$0xff] }
  0x19   :  { %1065 = vmatmul.msk.f32.gmra.mxu0 %vm261_vm0, %v37_v17  ;;  %1085 = vmatmul.msk.f32.gmra.mxu3 %vm261_vm0, %v57_v18  ;;  %v70_v56 = vld [vmem:[%s1841_s2 + $0x8] sm:$0xff]  ;;  %v45_v57 = vld [vmem:[%s1840_s1 + $0x50] sm:$0xff]  ;;  %v550_v59 = vld [vmem:[%s1843_s4 + $0x78] sm:$0xff] }
  0x1a   :  { %v65_v58 = vld [vmem:[%s1840_s1 + $0xf0] sm:$0xff]  ;;  %v548_v60 = vld [vmem:[%s1843_s4 + $0x68] sm:$0xff]  ;;  %v547_v61 = vld [vmem:[%s1843_s4 + $0x60] sm:$0xff] }
  0x1b   :  { %v46_v62 = vld [vmem:[%s1840_s1 + $0x58] sm:$0xff]  ;;  %v545_v0 = vld [vmem:[%s1843_s4 + $0x50] sm:$0xff]  ;;  %v543_v1 = vld [vmem:[%s1843_s4 + $0x40] sm:$0xff] }
  0x1c   :  { %v66_v63 = vld [vmem:[%s1840_s1 + $0xf8] sm:$0xff]  ;;  %v47_v3 = vld [vmem:[%s1840_s1 + $0x60] sm:$0xff]  ;;  %v544_v5 = vld [vmem:[%s1843_s4 + $0x48] sm:$0xff] }
  0x1d   :  { %v546_v2 = vld [vmem:[%s1843_s4 + $0x58] sm:$0xff]  ;;  %v541_v7 = vld [vmem:[%s1843_s4 + $0x30] sm:$0xff]  ;;  %v48_v8 = vld [vmem:[%s1840_s1 + $0x68] sm:$0xff] }
  0x1e   :  { %238 = vperm.xlu0 %1200, %v96_v19   ;;  %v542_v6 = vld [vmem:[%s1843_s4 + $0x38] sm:$0xff]  ;;  %v539_v10 = vld [vmem:[%s1843_s4 + $0x20] sm:$0xff]  ;;  %v537_v11 = vld [vmem:[%s1843_s4 + $0x10] sm:$0xff] }
  0x1f   :  { %158 = vperm.xlu2 %1202, %v80_v20   ;;  %153 = vperm.xlu1 %1201, %v79_v21   ;;  %v540_v12 = vld [vmem:[%s1843_s4 + $0x28] sm:$0xff]  ;;  %v49_v13 = vld [vmem:[%s1840_s1 + $0x70] sm:$0xff]  ;;  %v538_v16 = vld [vmem:[%s1843_s4 + $0x18] sm:$0xff] }
  0x20   :  { %v536_v17 = vld [vmem:[%s1843_s4 + $0x8] sm:$0xff]  ;;  %v535_v18 = vld [vmem:[%s1843_s4] sm:$0xff]  ;;  %v50_v20 = vld [vmem:[%s1840_s1 + $0x78] sm:$0xff] }
  0x21   :  { %1066 = vmatmul.msk.f32.gmra.mxu0 %vm261_vm0, %v38_v22  ;;  %1086 = vmatmul.msk.f32.gmra.mxu3 %vm261_vm0, %v58_v23  ;;  %v841_v23 = vld [vmem:[%s1845_s6] sm:$0xff] }
  0x26   :  { %223 = vperm.xlu0 %1200, %v93_v24   ;;  %v843_v24 = vld [vmem:[%s1845_s6 + $0x10] sm:$0xff] }
  0x27   :  { %228 = vperm.xlu1 %1201, %v94_v25   ;;  %143 = vperm.xlu2 %1202, %v77_v26   ;;  %v842_v25 = vld [vmem:[%s1845_s6 + $0x8] sm:$0xff] }
  0x29   :  { %1067 = vmatmul.msk.f32.gmra.mxu0 %vm261_vm0, %v39_v27  ;;  %1087 = vmatmul.msk.f32.gmra.mxu3 %vm261_vm0, %v59_v28  ;;  %v51_v27 = vld [vmem:[%s1840_s1 + $0x80] sm:$0xff] }
  0x2e   :  { %148 = vperm.xlu0 %1200, %v78_v29  }
  0x2f   :  { %213 = vperm.xlu1 %1201, %v91_v30   ;;  %218 = vperm.xlu2 %1202, %v92_v31   ;;  %v844_v31 = vld [vmem:[%s1845_s6 + $0x18] sm:$0xff] }
  0x31   :  { %1068 = vmatmul.msk.f32.gmra.mxu0 %vm261_vm0, %v40_v32  ;;  %1088 = vmatmul.msk.f32.gmra.mxu3 %vm261_vm0, %v60_v33  ;;  %v951_v33 = vld [vmem:[%s1846_s7 + $0x8] sm:$0xff] }
  0x36   :  { %133 = vperm.xlu0 %1200, %v75_v34   ;;  %v950_v34 = vld [vmem:[%s1846_s7] sm:$0xff] }
  0x37   :  { %203 = vperm.xlu2 %1202, %v89_v35   ;;  %138 = vperm.xlu1 %1201, %v76_v36   ;;  %v52_v36 = vld [vmem:[%s1840_s1 + $0x88] sm:$0xff] }
  0x39   :  { %1069 = vmatmul.msk.f32.gmra.mxu0 %vm261_vm0, %v41_v37  ;;  %1089 = vmatmul.msk.f32.gmra.mxu3 %vm261_vm0, %v61_v38 }
  0x3e   :  { %208 = vperm.xlu0 %1200, %v90_v39  }
  0x3f   :  { %128 = vperm.xlu2 %1202, %v74_v40   ;;  %123 = vperm.xlu1 %1201, %v73_v41   ;;  %v845_v40 = vld [vmem:[%s1845_s6 + $0x20] sm:$0xff] }
  0x41   :  { %1070 = vmatmul.msk.f32.gmra.mxu0 %vm261_vm0, %v42_v42  ;;  %1090 = vmatmul.msk.f32.gmra.mxu3 %vm261_vm0, %v62_v43  ;;  %v846_v42 = vld [vmem:[%s1845_s6 + $0x28] sm:$0xff]  ;;  %v952_v43 = vld [vmem:[%s1846_s7 + $0x10] sm:$0xff] }
  0x46   :  { %193 = vperm.xlu0 %1200, %v87_v44  }
  0x47   :  { %198 = vperm.xlu1 %1201, %v88_v45   ;;  %113 = vperm.xlu2 %1202, %v71_v46   ;;  %v53_v45 = vld [vmem:[%s1840_s1 + $0x90] sm:$0xff] }
  0x49   :  { %1071 = vmatmul.msk.f32.gmra.mxu0 %vm261_vm0, %v43_v47  ;;  %1091 = vmatmul.msk.f32.gmra.mxu3 %vm261_vm0, %v63_v48 }
  0x4e   :  { %118 = vperm.xlu0 %1200, %v72_v49   ;;  %v953_v49 = vld [vmem:[%s1846_s7 + $0x18] sm:$0xff] }
  0x4f   :  { %183 = vperm.xlu1 %1201, %v85_v50   ;;  %188 = vperm.xlu2 %1202, %v86_v51   ;;  %v954_v51 = vld [vmem:[%s1846_s7 + $0x20] sm:$0xff] }
  0x51   :  { %1072 = vmatmul.msk.f32.gmra.mxu0 %vm261_vm0, %v44_v52  ;;  %1092 = vmatmul.msk.f32.gmra.mxu3 %vm261_vm0, %v64_v53  ;;  %v847_v52 = vld [vmem:[%s1845_s6 + $0x30] sm:$0xff] }
  0x56   :  { %103 = vperm.xlu0 %1200, %v69_v54   ;;  %v54_v54 = vld [vmem:[%s1840_s1 + $0x98] sm:$0xff] }
  0x57   :  { %623 = vperm.xlu2 %1202, %v549_v55   ;;  %108 = vperm.xlu1 %1201, %v70_v56  }
  0x59   :  { %1073 = vmatmul.msk.f32.gmra.mxu0 %vm261_vm0, %v45_v57  ;;  %1093 = vmatmul.msk.f32.gmra.mxu3 %vm261_vm0, %v65_v58  ;;  %v848_v58 = vld [vmem:[%s1845_s6 + $0x38] sm:$0xff] }
  0x5e   :  { %628 = vperm.xlu0 %1200, %v550_v59  }
  0x5f   :  { %618 = vperm.xlu2 %1202, %v548_v60   ;;  %613 = vperm.xlu1 %1201, %v547_v61   ;;  %v956_v60 = vld [vmem:[%s1846_s7 + $0x30] sm:$0xff]  ;;  %v955_v61 = vld [vmem:[%s1846_s7 + $0x28] sm:$0xff] }
  0x61   :  { %1074 = vmatmul.msk.f32.gmra.mxu0 %vm261_vm0, %v46_v62  ;;  %1094 = vmatmul.msk.f32.gmra.mxu3 %vm261_vm0, %v66_v63  ;;  %v1510_v4 = vpop.permute.xlu2 %243 }
  0x66   :  { %603 = vperm.xlu0 %1200, %v545_v0  }
  0x67   :  { %593 = vperm.xlu2 %1202, %v543_v1   ;;  %608 = vperm.xlu1 %1201, %v546_v2  }
  0x69   :  { %1075 = vmatmul.msk.f32.gmra.mxu0 %vm261_vm0, %v47_v3  ;;  %v1526_v9 = vpop.permute.xlu2 %248 }
  0x6e   :  { %598 = vperm.xlu0 %1200, %v544_v5  }
  0x6f   :  { %588 = vperm.xlu2 %1202, %v542_v6   ;;  %583 = vperm.xlu1 %1201, %v541_v7   ;;  %v957_v7 = vld [vmem:[%s1846_s7 + $0x38] sm:$0xff] }
  0x71   :  { %1076 = vmatmul.msk.f32.gmra.mxu0 %vm261_vm0, %v48_v8  ;;  %v1554_v19 = vpop.permute.xlu2 %233 }
  0x76   :  { %573 = vperm.xlu0 %1200, %v539_v10   ;;  %v1019_v10 = vld [vmem:[#allocation2] sm:$0x1] }
  0x77   :  { %563 = vperm.xlu2 %1202, %v537_v11   ;;  %578 = vperm.xlu1 %1201, %v540_v12  }
  0x78   :  { %v1540_v14 = vpop.permute.xlu0 %253 }
  0x79   :  { %v1542_v15 = vpop.permute.xlu1 %173  ;;  %1077 = vmatmul.msk.f32.gmra.mxu0 %vm261_vm0, %v49_v13  ;;  %v1578_v28 = vpop.permute.xlu2 %158 }
  0x7e   :  { %568 = vperm.xlu0 %1200, %v538_v16  }
  0x7f   :  { %558 = vperm.xlu2 %1202, %v536_v17   ;;  %553 = vperm.xlu1 %1201, %v535_v18  }
  0x80   :  { %v1559_v21 = vpop.permute.xlu0 %258 }
  0x81   :  { %v1561_v22 = vpop.permute.xlu1 %178  ;;  %1078 = vmatmul.msk.f32.gmra.mxu0 %vm261_vm0, %v50_v20  ;;  %v1601_v38 = vpop.permute.xlu2 %143 }
  0x86   :  { %v1573_v26 = vpop.f32.mrf.mxu0  ;;  %851 = vperm.xlu0 %1200, %v841_v23  }
  0x87   :  { %861 = vperm.xlu2 %1202, %v843_v24   ;;  %856 = vperm.xlu1 %1201, %v842_v25  }
  0x88   :  { %v1580_v29 = vpop.permute.xlu0 %163 }
  0x89   :  { %v1582_v30 = vpop.permute.xlu1 %168  ;;  %1079 = vmatmul.msk.f32.gmra.mxu0 %vm261_vm0, %v51_v27  ;;  %v219_v48 = vpop.permute.xlu2 %218 }
  0x8c   :  { %v435_v32 = vpop.f32.mrf.mxu3 }
  0x8e   :  { %v1594_v35 = vpop.f32.mrf.mxu0  ;;  %866 = vperm.xlu0 %1200, %v844_v31  }
  0x8f   :  { %965 = vperm.xlu2 %1202, %v951_v33   ;;  %960 = vperm.xlu1 %1201, %v950_v34  }
  0x90   :  { %v1599_v37 = vpop.permute.xlu0 %238 }
  0x91   :  { %v1603_v39 = vpop.permute.xlu1 %153  ;;  %1080 = vmatmul.msk.f32.gmra.mxu0 %vm261_vm0, %v52_v36  ;;  %v204_v62 = vpop.permute.xlu2 %203 }
  0x92   :  { %v436_v12 = vadd.f32 %v435_v32, %v204_v62 }
  0x94   :  { %v438_v41 = vpop.f32.mrf.mxu3  ;;  %v491_v24 = vmax.f32 %v436_v12, 0.0 }
  0x96   :  { %v1615_v44 = vpop.f32.mrf.mxu0  ;;  %871 = vperm.xlu0 %1200, %v845_v40  }
  0x97   :  { %876 = vperm.xlu2 %1202, %v846_v42   ;;  %970 = vperm.xlu1 %1201, %v952_v43  }
  0x98   :  { %v1620_v46 = vpop.permute.xlu0 %223 }
  0x99   :  { %v1622_v47 = vpop.permute.xlu1 %228  ;;  %1081 = vmatmul.msk.f32.gmra.mxu0 %vm261_vm0, %v53_v45  ;;  %v129_v13 = vpop.permute.xlu2 %128 }
  0x9c   :  { %v441_v50 = vpop.f32.mrf.mxu3 }
  0x9e   :  { %v384_v53 = vpop.f32.mrf.mxu0  ;;  %975 = vperm.xlu0 %1200, %v953_v49  }
  0x9f   :  { %980 = vperm.xlu2 %1202, %v954_v51   ;;  %881 = vperm.xlu1 %1201, %v847_v52  }
  0xa0   :  { %v1637_v55 = vpop.permute.xlu0 %148 }
  0xa1   :  { %v214_v56 = vpop.permute.xlu1 %213  ;;  %1082 = vmatmul.msk.f32.gmra.mxu0 %vm261_vm0, %v54_v54  ;;  %v114_v43 = vpop.permute.xlu2 %113 }
  0xa2   :  { %v442_v57 = vadd.f32 %v441_v50, %v214_v56  ;;  %v382_v49 = vadd.f32 %v1615_v44, %v114_v43 }
  0xa4   :  { %v444_v59 = vpop.f32.mrf.mxu3  ;;  %v493_v63 = vmax.f32 %v442_v57, 0.0 }
  0xa5   :  { %v445_v0 = vadd.f32 %v444_v59, %v219_v48 }
  0xa6   :  { %v387_v1 = vpop.f32.mrf.mxu0  ;;  %886 = vperm.xlu0 %1200, %v848_v58   ;;  %v473_v58 = vmax.f32 %v382_v49, 0.0 }
  0xa7   :  { %v494_v2 = vmax.f32 %v445_v0, 0.0  ;;  %990 = vperm.xlu2 %1202, %v956_v60   ;;  %985 = vperm.xlu1 %1201, %v955_v61  }
  0xa8   :  { %v134_v3 = vpop.permute.xlu0 %133 }
  0xa9   :  { %v139_v5 = vpop.permute.xlu1 %138  ;;  %v1649_v6 = vpack.c.bf16 %v494_v2, %v493_v63 }
  0xac   :  { %v1654_v8 = vpop.f32.mrf.mxu3 }
  0xae   :  { %v390_v11 = vpop.f32.mrf.mxu0  ;;  %995 = vperm.xlu0 %1200, %v957_v7  }
  0xaf   :  { %1022 = vperm.xlu1 %1201, %v1019_v10   ;;  %v391_v16 = vadd.f32 %v390_v11, %v129_v13 }
  0xb0   :  { %v209_v17 = vpop.permute.xlu0 %208 }
  0xb1   :  { %v439_v18 = vadd.f32 %v438_v41, %v209_v17  ;;  %v124_v20 = vpop.permute.xlu1 %123  ;;  %v476_v27 = vmax.f32 %v391_v16, 0.0 }
  0xb2   :  { %v388_v23 = vadd.f32 %v387_v1, %v124_v20 }
  0xb3   :  { %v492_v25 = vmax.f32 %v439_v18, 0.0 }
  0xb4   :  { %v475_v31 = vmax.f32 %v388_v23, 0.0  ;;  %v450_v33 = vpop.f32.mrf.mxu3 }
  0xb5   :  { %v1656_v34 = vpack.c.bf16 %v492_v25, %v491_v24 }
  0xb6   :  { %v393_v36 = vpop.f32.mrf.mxu0  ;;  %v1658_v40 = vpack.c.bf16 %v476_v27, %v475_v31 }
  0xb7   :  { %v394_v48 = vadd.f32 %v393_v36, %v134_v3 }
  0xb8   :  { %v1660_v42 = vpop.permute.xlu0 %193 }
  0xb9   :  { %v1662_v32 = vpop.permute.xlu1 %198  ;;  %v477_v52 = vmax.f32 %v394_v48, 0.0 }
  0xbc   :  { %v453_v45 = vpop.f32.mrf.mxu3 }
  0xbd   :  { %v454_v27 = vadd.f32 %v453_v45, %v1554_v19 }
  0xbe   :  { %v396_v41 = vpop.f32.mrf.mxu0 }
  0xbf   :  { %v397_v50 = vadd.f32 %v396_v41, %v139_v5  ;;  %v497_v41 = vmax.f32 %v454_v27, 0.0  ;;  %v1113_v27 = vld [vmem:[%s1842_s3 + $0x20] sm:$0xf] }
  0xc0   :  { %v119_v51 = vpop.permute.xlu0 %118 }
  0xc1   :  { %v478_v54 = vmax.f32 %v397_v50, 0.0  ;;  %v1665_v56 = vpop.permute.xlu1 %183  ;;  %v385_v57 = vadd.f32 %v384_v53, %v119_v51 }
  0xc3   :  { %v474_v59 = vmax.f32 %v385_v57, 0.0  ;;  %v1667_v60 = vpack.c.bf16 %v478_v54, %v477_v52 }
  0xc4   :  { %v456_v61 = vpop.f32.mrf.mxu3 }
  0xc5   :  { %v1669_v62 = vpack.c.bf16 %v474_v59, %v473_v58  ;;  %v457_v31 = vadd.f32 %v456_v61, %v1599_v37 }
  0xc6   :  { %v399_v63 = vpop.f32.mrf.mxu0 }
  0xc8   :  { %v104_v0 = vpop.permute.xlu0 %103 }
  0xc9   :  { %v109_v1 = vpop.permute.xlu1 %108  ;;  %v376_v2 = vadd.f32 %v1573_v26, %v104_v0 }
  0xca   :  { %v379_v44 = vadd.f32 %v1594_v35, %v109_v1 }
  0xcb   :  { %v471_v3 = vmax.f32 %v376_v2, 0.0 }
  0xcc   :  { %v472_v5 = vmax.f32 %v379_v44, 0.0  ;;  %v459_v7 = vpop.f32.mrf.mxu3 }
  0xcd   :  { %v460_v20 = vadd.f32 %v459_v7, %v1510_v4  ;;  %v451_v4 = vadd.f32 %v450_v33, %v1622_v47  ;;  %v189_v7 = vpop.permute.xlu2 %188 }
  0xce   :  { %v402_v10 = vpop.f32.mrf.mxu0  ;;  %v1673_v11 = vpack.c.bf16 %v472_v5, %v471_v3 }
  0xcf   :  { %v499_v36 = vmax.f32 %v460_v20, 0.0  ;;  %v496_v51 = vmax.f32 %v451_v4, 0.0  ;;  %v403_v1 = vadd.f32 %v402_v10, %v1637_v55  ;;  %v1121_v4 = vld [vmem:[%s1842_s3 + $0x30] sm:$0xf] }
  0xd4   :  { %v462_v53 = vpop.f32.mrf.mxu3 }
  0xd5   :  { %v463_v23 = vadd.f32 %v462_v53, %v1526_v9  ;;  %v498_v9 = vmax.f32 %v457_v31, 0.0  ;;  %v1181_v31 = vld [vmem:[%s1842_s3 + $0x24] sm:$0xf0] }
  0xd6   :  { %v405_v12 = vpop.f32.mrf.mxu0 }
  0xd7   :  { %v500_v43 = vmax.f32 %v463_v23, 0.0  ;;  %v532_v52 = vpack.c.bf16 %v498_v9, %v497_v41  ;;  %v406_v0 = vadd.f32 %v405_v12, %v1603_v39  ;;  %v1183_v41 = vld [vmem:[%s1842_s3 + $0x34] sm:$0xf0] }
  0xd8   :  { %v1122_v9 = vor.u32 %v1183_v41, %v1121_v4 }
  0xd9   :  { %v533_v49 = vpack.c.bf16 %v500_v43, %v499_v36  ;;  %v1114_v36 = vor.u32 %v1181_v31, %v1113_v27  ;;  %v1180_v43 = vld [vmem:[%s1842_s3 + $0x24] sm:$0xf] }
  0xdc   :  { %v465_v13 = vpop.f32.mrf.mxu3 }
  0xdd   :  { %v466_v17 = vadd.f32 %v465_v13, %v1540_v14  ;;  %v448_v14 = vadd.f32 %v1654_v8, %v1620_v46 }
  0xde   :  { %v408_v16 = vpop.f32.mrf.mxu0 }
  0xdf   :  { %v501_v24 = vmax.f32 %v466_v17, 0.0  ;;  %v495_v50 = vmax.f32 %v448_v14, 0.0  ;;  %v409_v58 = vadd.f32 %v408_v16, %v1578_v28 }
  0xe1   :  { %v531_v19 = vpack.c.bf16 %v496_v51, %v495_v50  ;;  %v1129_v51 = vld [vmem:[%s1842_s3 + $0x40] sm:$0xf] }
  0xe4   :  { %v468_v18 = vpop.f32.mrf.mxu3 }
  0xe5   :  { %v469_v26 = vadd.f32 %v468_v18, %v1559_v21  ;;  %v1176_v18 = vld [vmem:[%s1842_s3 + $0x4] sm:$0xf] }
  0xe6   :  { %v411_v35 = vpop.f32.mrf.mxu0 }
  0xe7   :  { %v502_v25 = vmax.f32 %v469_v26, 0.0  ;;  %v412_v8 = vadd.f32 %v411_v35, %v1580_v29  ;;  %v480_v29 = vmax.f32 %v403_v1, 0.0  ;;  %v1178_v35 = vld [vmem:[%s1842_s3 + $0x14] sm:$0xf]  ;;  %v1188_v1 = vld [vmem:[%s1842_s3 + $0x64] sm:$0xf] }
  0xe9   :  { %v534_v48 = vpack.c.bf16 %v502_v25, %v501_v24  ;;  %v1107_v24 = vld [vmem:[%s1842_s3 + $0x18] sm:$0xf0] }
  0xea   :  { %v1110_v25 = vor.u32 %v1178_v35, %v1107_v24 }
  0xeb   :  { %760 = vmatpush.bf16.msra.mxu2 %v534_v48  ;;  %v1115_v48 = vld [vmem:[%s1842_s3 + $0x28] sm:$0xf0] }
  0xec   :  { %v1118_v14 = vor.u32 %v1180_v43, %v1115_v48 }
  0xee   :  { %v414_v21 = vpop.f32.mrf.mxu0 }
  0xef   :  { %761 = vmatpush.bf16.msra.mxu2 %v533_v49  ;;  %v415_v46 = vadd.f32 %v414_v21, %v1582_v30  ;;  %v482_v30 = vmax.f32 %v409_v58, 0.0  ;;  %v1182_v49 = vld [vmem:[%s1842_s3 + $0x34] sm:$0xf]  ;;  %v1123_v21 = vld [vmem:[%s1842_s3 + $0x38] sm:$0xf0] }
  0xf0   :  { %v1126_v50 = vor.u32 %v1182_v49, %v1123_v21 }
  0xf1   :  { %v484_v59 = vmax.f32 %v415_v46, 0.0  ;;  %v1137_v46 = vld [vmem:[%s1842_s3 + $0x50] sm:$0xf] }
  0xf3   :  { %762 = vmatpush.bf16.msra.mxu2 %v532_v52  ;;  %v1185_v52 = vld [vmem:[%s1842_s3 + $0x44] sm:$0xf0] }
  0xf6   :  { %v417_v37 = vpop.f32.mrf.mxu0 }
  0xf7   :  { %763 = vmatpush.bf16.msra.mxu2 %v531_v19  ;;  %v418_v45 = vadd.f32 %v417_v37, %v1542_v15  ;;  %v1130_v19 = vor.u32 %v1185_v52, %v1129_v51  ;;  %v1184_v37 = vld [vmem:[%s1842_s3 + $0x44] sm:$0xf] }
  0xf9   :  { %v485_v33 = vmax.f32 %v418_v45, 0.0  ;;  %v1131_v45 = vld [vmem:[%s1842_s3 + $0x48] sm:$0xf0] }
  0xfb   :  { %764 = vmatpush.bf16.msra.mxu2 %v1649_v6  ;;  %v483_v6 = vmax.f32 %v412_v8, 0.0 }
  0xfd   :  { %v525_v2 = vpack.c.bf16 %v484_v59, %v483_v6  ;;  %v1145_v59 = vld [vmem:[%s1842_s3 + $0x60] sm:$0xf]  ;;  %v1779_v6 = vpop.permute.xlu2 %623 }
  0xfe   :  { %v420_v54 = vpop.f32.mrf.mxu0 }
  0xff   :  { %v421_v47 = vadd.f32 %v420_v54, %v1561_v22  ;;  %765 = vmatpush.bf16.msra.mxu2 %v1656_v34  ;;  %v400_v22 = vadd.f32 %v399_v63, %v1601_v38  ;;  %v481_v34 = vmax.f32 %v406_v0, 0.0  ;;  %v1097_v38 = vld [vmem:[%s1842_s3] sm:$0xf]  ;;  %v1177_v63 = vld [vmem:[%s1842_s3 + $0x4] sm:$0xf0]  ;;  %v1134_v54 = vor.u32 %v1184_v37, %v1131_v45 }
 0x100   :  { %v1098_v12 = vor.u32 %v1177_v63, %v1097_v38  ;;  %v1805_v63 = vpop.permute.xlu0 %628 }
 0x101   :  { %v486_v57 = vmax.f32 %v421_v47, 0.0  ;;  %v524_v44 = vpack.c.bf16 %v482_v30, %v481_v34  ;;  %v479_v3 = vmax.f32 %v400_v22, 0.0  ;;  %v1187_v47 = vld [vmem:[%s1842_s3 + $0x54] sm:$0xf0]  ;;  %v1147_v30 = vld [vmem:[%s1842_s3 + $0x68] sm:$0xf0] }
 0x102   :  { %v1138_v8 = vor.u32 %v1187_v47, %v1137_v46  ;;  %v1153_v34 = vld [vmem:[%s1842_s3 + $0x70] sm:$0xf] }
 0x103   :  { %v526_v61 = vpack.c.bf16 %v486_v57, %v485_v33  ;;  %v523_v5 = vpack.c.bf16 %v480_v29, %v479_v3  ;;  %v1186_v33 = vld [vmem:[%s1842_s3 + $0x54] sm:$0xf]  ;;  %v1139_v57 = vld [vmem:[%s1842_s3 + $0x58] sm:$0xf0]  ;;  %v1191_v29 = vld [vmem:[%s1842_s3 + $0x74] sm:$0xf0] }
 0x104   :  { %v1142_v58 = vor.u32 %v1186_v33, %v1139_v57  ;;  %v1154_v3 = vor.u32 %v1191_v29, %v1153_v34 }
 0x105   :  { %711 = vmatpush.bf16.msra.mxu1 %v526_v61  ;;  %v1189_v61 = vld [vmem:[%s1842_s3 + $0x64] sm:$0xf0]  ;;  %v1789_v22 = vpop.permute.xlu2 %618 }
 0x106   :  { %v423_v15 = vpop.f32.mrf.mxu0  ;;  %v1146_v0 = vor.u32 %v1189_v61, %v1145_v59 }
 0x109   :  { %712 = vmatpush.bf16.msra.mxu1 %v525_v2  ;;  %v1150_v2 = vor.u32 %v1188_v1, %v1147_v30 }
 0x10d   :  { %713 = vmatpush.bf16.msra.mxu1 %v524_v44 }
 0x10e   :  { %v426_v28 = vpop.f32.mrf.mxu0 }
 0x10f   :  { %v427_v53 = vadd.f32 %v426_v28, %v189_v7  ;;  %v1190_v28 = vld [vmem:[%s1842_s3 + $0x74] sm:$0xf] }
 0x111   :  { %714 = vmatpush.bf16.msra.mxu1 %v523_v5  ;;  %v1155_v5 = vld [vmem:[%s1842_s3 + $0x78] sm:$0xf0] }
 0x115   :  { %715 = vmatpush.bf16.msra.mxu1 %v1667_v60 }
 0x116   :  { %v429_v39 = vpop.f32.mrf.mxu0 }
 0x117   :  { %v430_v55 = vadd.f32 %v429_v39, %v1660_v42  ;;  %v594_v39 = vpop.permute.xlu2 %593 }
 0x119   :  { %716 = vmatpush.bf16.msra.mxu1 %v1658_v40  ;;  %v424_v40 = vadd.f32 %v423_v15, %v1665_v56  ;;  %v489_v13 = vmax.f32 %v430_v55, 0.0  ;;  %v1105_v56 = vld [vmem:[%s1842_s3 + $0x10] sm:$0xf]  ;;  %v1781_v15 = vpop.permute.xlu1 %613  ;;  %v1158_v55 = vor.u32 %v1190_v28, %v1155_v5 }
 0x11b   :  { %v487_v17 = vmax.f32 %v424_v40, 0.0 }
 0x11d   :  { %717 = vmatpush.bf16.msra.mxu1 %v1669_v62  ;;  %v488_v62 = vmax.f32 %v427_v53, 0.0 }
 0x11e   :  { %v432_v10 = vpop.f32.mrf.mxu0 }
 0x11f   :  { %v433_v60 = vadd.f32 %v432_v10, %v1662_v32  ;;  %v1099_v32 = vld [vmem:[%s1842_s3 + $0x8] sm:$0xf0]  ;;  %v527_v20 = vpack.c.bf16 %v488_v62, %v487_v17  ;;  %v589_v7 = vpop.permute.xlu2 %588 }
 0x120   :  { %v1102_v23 = vor.u32 %v1176_v18, %v1099_v32 }
 0x121   :  { %v490_v42 = vmax.f32 %v433_v60, 0.0  ;;  %718 = vmatpush.bf16.msra.mxu1 %v1673_v11  ;;  %v1179_v11 = vld [vmem:[%s1842_s3 + $0x14] sm:$0xf0]  ;;  %v1797_v44 = vpop.permute.xlu1 %608  ;;  %v1807_v60 = vpop.permute.xlu0 %603 }
 0x122   :  { %v1106_v26 = vor.u32 %v1179_v11, %v1105_v56 }
 0x123   :  { %v528_v16 = vpack.c.bf16 %v490_v42, %v489_v13 }
 0x124   :  { %719 = vmatmul.bf16.vlgmr.msra.gmra.mxu1 %v1098_v12 }
 0x125   :  { %766 = vmatpush.bf16.msra.mxu2 %v528_v16 }
 0x127   :  { %v564_v40 = vpop.permute.xlu2 %563 }
 0x129   :  { %767 = vmatpush.bf16.msra.mxu2 %v527_v20  ;;  %v584_v38 = vpop.permute.xlu1 %583  ;;  %v1809_v17 = vpop.permute.xlu0 %598 }
 0x12c   :  { %768 = vmatmul.bf16.vlgmr.msra.gmra.mxu2 %v1102_v23 }
 0x12f   :  { %v559_v32 = vpop.permute.xlu2 %558 }
 0x131   :  { %v579_v53 = vpop.permute.xlu1 %578  ;;  %v574_v24 = vpop.permute.xlu0 %573 }
 0x134   :  { %724 = vmatmul.bf16.gmra.mxu1 %v1106_v26 }
 0x139   :  { %v554_v13 = vpop.permute.xlu1 %553  ;;  %v569_v48 = vpop.permute.xlu0 %568 }
 0x13c   :  { %773 = vmatmul.bf16.gmra.mxu2 %v1110_v25 }
 0x144   :  { %729 = vmatmul.bf16.gmra.mxu1 %v1114_v36 }
 0x14c   :  { %778 = vmatmul.bf16.gmra.mxu2 %v1118_v14 }
 0x154   :  { %734 = vmatmul.bf16.gmra.mxu1 %v1122_v9 }
 0x15c   :  { %783 = vmatmul.bf16.gmra.mxu2 %v1126_v50 }
 0x164   :  { %739 = vmatmul.bf16.gmra.mxu1 %v1130_v19 }
 0x16c   :  { %788 = vmatmul.bf16.gmra.mxu2 %v1134_v54 }
 0x174   :  { %744 = vmatmul.bf16.gmra.mxu1 %v1138_v8 }
 0x17c   :  { %793 = vmatmul.bf16.gmra.mxu2 %v1142_v58 }
 0x184   :  { %749 = vmatmul.bf16.gmra.mxu1 %v1146_v0 }
 0x18c   :  { %798 = vmatmul.bf16.gmra.mxu2 %v1150_v2 }
 0x194   :  { %754 = vmatmul.bf16.gmra.mxu1 %v1154_v3 }
 0x19c   :  { %803 = vmatmul.bf16.gmra.mxu2 %v1158_v55 }
 0x1a1   :  { %v720_v10 = vpop.f32.mrf.mxu1 }
 0x1a2   :  { %v721_v42 = vadd.f32 %v720_v10, %v554_v13 }
 0x1a9   :  { %v722_v12 = vpop.f32.mrf.mxu1 }
 0x1aa   :  { %v723_v20 = vadd.f32 %v722_v12, %v559_v32 }
 0x1af   :  { %v769_v62 = vpop.f32.mrf.mxu2 }
 0x1b0   :  { %v770_v16 = vadd.f32 %v769_v62, %v721_v42 }
 0x1b1   :  { %v725_v18 = vpop.f32.mrf.mxu1 }
 0x1b2   :  { %v809_v26 = vmax.f32 %v770_v16, 0.0  ;;  %v726_v27 = vadd.f32 %v725_v18, %v564_v40 }
 0x1b7   :  { %v771_v23 = vpop.f32.mrf.mxu2 }
 0x1b8   :  { %v772_v56 = vadd.f32 %v771_v23, %v723_v20 }
 0x1b9   :  { %v727_v11 = vpop.f32.mrf.mxu1 }
 0x1ba   :  { %v810_v35 = vmax.f32 %v772_v56, 0.0  ;;  %v728_v14 = vadd.f32 %v727_v11, %v569_v48 }
 0x1bc   :  { %v1811_v25 = vpack.c.bf16 %v810_v35, %v809_v26 }
 0x1bf   :  { %v774_v31 = vpop.f32.mrf.mxu2 }
 0x1c0   :  { %v775_v36 = vadd.f32 %v774_v31, %v726_v27 }
 0x1c1   :  { %v730_v43 = vpop.f32.mrf.mxu1 }
 0x1c2   :  { %v811_v49 = vmax.f32 %v775_v36, 0.0  ;;  %v731_v51 = vadd.f32 %v730_v43, %v574_v24 }
 0x1c7   :  { %v776_v4 = vpop.f32.mrf.mxu2 }
 0x1c8   :  { %v777_v41 = vadd.f32 %v776_v4, %v728_v14 }
 0x1c9   :  { %v732_v9 = vpop.f32.mrf.mxu1 }
 0x1ca   :  { %v812_v21 = vmax.f32 %v777_v41, 0.0  ;;  %v733_v45 = vadd.f32 %v732_v9, %v579_v53 }
 0x1cc   :  { %v1813_v50 = vpack.c.bf16 %v812_v21, %v811_v49 }
 0x1cf   :  { %v779_v52 = vpop.f32.mrf.mxu2 }
 0x1d0   :  { %v780_v19 = vadd.f32 %v779_v52, %v731_v51 }
 0x1d1   :  { %v735_v37 = vpop.f32.mrf.mxu1 }
 0x1d2   :  { %v813_v8 = vmax.f32 %v780_v19, 0.0  ;;  %v736_v58 = vadd.f32 %v735_v37, %v584_v38 }
 0x1d7   :  { %v781_v54 = vpop.f32.mrf.mxu2 }
 0x1d8   :  { %v782_v46 = vadd.f32 %v781_v54, %v733_v45  ;;  %v1194_v45 = vld [vmem:[%s1844_s5 + $0x10] sm:$0xff] }
 0x1d9   :  { %v737_v47 = vpop.f32.mrf.mxu1 }
 0x1da   :  { %v814_v33 = vmax.f32 %v782_v46, 0.0  ;;  %v738_v1 = vadd.f32 %v737_v47, %v589_v7  ;;  %v852_v47 = vpop.permute.xlu0 %851 }
 0x1dc   :  { %v835_v57 = vpack.c.bf16 %v814_v33, %v813_v8  ;;  %v862_v8 = vpop.permute.xlu2 %861 }
 0x1df   :  { %v784_v59 = vpop.f32.mrf.mxu2 }
 0x1e0   :  { %v785_v61 = vadd.f32 %v784_v59, %v736_v58 }
 0x1e1   :  { %v740_v0 = vpop.f32.mrf.mxu1 }
 0x1e2   :  { %v815_v29 = vmax.f32 %v785_v61, 0.0  ;;  %v741_v5 = vadd.f32 %v740_v0, %v594_v39 }
 0x1e4   :  { %v966_v61 = vpop.permute.xlu2 %965 }
 0x1e7   :  { %v786_v30 = vpop.f32.mrf.mxu2 }
 0x1e8   :  { %v787_v2 = vadd.f32 %v786_v30, %v738_v1 }
 0x1e9   :  { %v742_v34 = vpop.f32.mrf.mxu1 }
 0x1ea   :  { %v816_v3 = vmax.f32 %v787_v2, 0.0 }
 0x1ec   :  { %v836_v28 = vpack.c.bf16 %v816_v3, %v815_v29  ;;  %v877_v2 = vpop.permute.xlu2 %876 }
 0x1ef   :  { %v789_v55 = vpop.f32.mrf.mxu2 }
 0x1f0   :  { %v790_v10 = vadd.f32 %v789_v55, %v741_v5 }
 0x1f1   :  { %v745_v53 = vpop.f32.mrf.mxu1 }
 0x1f2   :  { %v746_v14 = vadd.f32 %v745_v53, %v1807_v60  ;;  %v817_v19 = vmax.f32 %v790_v10, 0.0  ;;  %v1192_v60 = vld [vmem:[%s1844_s5] sm:$0xff] }
 0x1f7   :  { %v791_v12 = vpop.f32.mrf.mxu2 }
 0x1f9   :  { %v747_v40 = vpop.f32.mrf.mxu1 }
 0x1fa   :  { %v748_v31 = vadd.f32 %v747_v40, %v1797_v44 }
 0x1ff   :  { %v794_v13 = vpop.f32.mrf.mxu2 }
 0x200   :  { %v795_v9 = vadd.f32 %v794_v13, %v746_v14 }
 0x201   :  { %v750_v42 = vpop.f32.mrf.mxu1 }
 0x202   :  { %v751_v35 = vadd.f32 %v750_v42, %v1781_v15  ;;  %v819_v51 = vmax.f32 %v795_v9, 0.0  ;;  %v981_v42 = vpop.permute.xlu2 %980 }
 0x207   :  { %v796_v62 = vpop.f32.mrf.mxu2 }
 0x208   :  { %v797_v4 = vadd.f32 %v796_v62, %v748_v31 }
 0x209   :  { %v752_v38 = vpop.f32.mrf.mxu1 }
 0x20a   :  { %v753_v56 = vadd.f32 %v752_v38, %v1789_v22  ;;  %v743_v22 = vadd.f32 %v742_v34, %v1809_v17  ;;  %v820_v21 = vmax.f32 %v797_v4, 0.0  ;;  %v1193_v17 = vld [vmem:[%s1844_s5 + $0x8] sm:$0xff] }
 0x20c   :  { %v792_v49 = vadd.f32 %v791_v12, %v743_v22  ;;  %v838_v44 = vpack.c.bf16 %v820_v21, %v819_v51 }
 0x20e   :  { %v818_v52 = vmax.f32 %v792_v49, 0.0 }
 0x20f   :  { %v799_v16 = vpop.f32.mrf.mxu2 }
 0x210   :  { %v800_v36 = vadd.f32 %v799_v16, %v751_v35  ;;  %v837_v37 = vpack.c.bf16 %v818_v52, %v817_v19 }
 0x211   :  { %v755_v32 = vpop.f32.mrf.mxu1 }
 0x212   :  { %v756_v23 = vadd.f32 %v755_v32, %v1779_v6 }
 0x217   :  { %v801_v18 = vpop.f32.mrf.mxu2 }
 0x218   :  { %v802_v24 = vadd.f32 %v801_v18, %v753_v56 }
 0x219   :  { %v757_v20 = vpop.f32.mrf.mxu1 }
 0x21a   :  { %v758_v39 = vadd.f32 %v757_v20, %v1805_v63  ;;  %v822_v41 = vmax.f32 %v802_v24, 0.0  ;;  %v821_v63 = vmax.f32 %v800_v36, 0.0 }
 0x21c   :  { %v839_v15 = vpack.c.bf16 %v822_v41, %v821_v63 }
 0x21f   :  { %v804_v7 = vpop.f32.mrf.mxu2 }
 0x220   :  { %v805_v11 = vadd.f32 %v804_v7, %v756_v23 }
 0x222   :  { %v823_v43 = vmax.f32 %v805_v11, 0.0 }
 0x227   :  { %v806_v26 = vpop.f32.mrf.mxu2 }
 0x228   :  { %v807_v27 = vadd.f32 %v806_v26, %v758_v39 }
 0x22a   :  { %v824_v48 = vmax.f32 %v807_v27, 0.0 }
 0x22c   :  { %v840_v6 = vpack.c.bf16 %v824_v48, %v823_v43  ;;  %v991_v48 = vpop.permute.xlu2 %990 }
 0x22e   :  { %913 = vmatpush.bf16.msrb.mxu3 %v840_v6 }
 0x232   :  { %914 = vmatpush.bf16.msrb.mxu3 %v839_v15 }
 0x236   :  { %915 = vmatpush.bf16.msrb.mxu3 %v838_v44 }
 0x23a   :  { %916 = vmatpush.bf16.msrb.mxu3 %v837_v37 }
 0x23e   :  { %917 = vmatpush.bf16.msrb.mxu3 %v836_v28 }
 0x242   :  { %918 = vmatpush.bf16.msrb.mxu3 %v835_v57  ;;  %v867_v57 = vpop.permute.xlu0 %866 }
 0x246   :  { %919 = vmatpush.bf16.msrb.mxu3 %v1813_v50  ;;  %v1195_v50 = vld [vmem:[%s1844_s5 + $0x18] sm:$0xff]  ;;  %s1234_s5 = smov [#allocation3]  }
 0x247   :  { %s1052_s4 = sshll.u32 %s1234_s5, 4  ;;  %s1053_s4 = int_to_ptr.vmem [resolvable:$true] %s1052_s4 }
 0x24a   :  { %920 = vmatpush.bf16.msrb.mxu3 %v1811_v25  ;;  %v857_v25 = vpop.permute.xlu1 %856  ;;  %v872_v0 = vpop.permute.xlu0 %871 }
 0x24d   :  { %921 = vmatmul.bf16.vlgmr.msrb.gmra.mxu3 %v1192_v60 }
 0x252   :  { %v961_v58 = vpop.permute.xlu1 %960  ;;  %v976_v29 = vpop.permute.xlu0 %975 }
 0x25a   :  { %v971_v30 = vpop.permute.xlu1 %970  ;;  %v887_v56 = vpop.permute.xlu0 %886 }
 0x25d   :  { %926 = vmatmul.bf16.gmra.mxu3 %v1193_v17 }
 0x262   :  { %v882_v53 = vpop.permute.xlu1 %881  ;;  %v996_v63 = vpop.permute.xlu0 %995 }
 0x26a   :  { %v986_v31 = vpop.permute.xlu1 %985 }
 0x26d   :  { %931 = vmatmul.bf16.gmra.mxu3 %v1194_v45 }
 0x272   :  { %v1023_v37 = vpop.permute.xlu1 %1022 }
 0x273   :  { %v1025_v17 = vperm.slane %v1023_v37, 0 }
 0x27d   :  { %936 = vmatmul.bf16.gmra.mxu3 %v1195_v50 }
 0x2d0   :  { %v922_v54 = vpop.f32.mrf.mxu3 }
 0x2d1   :  { %v923_v28 = vadd.f32 %v922_v54, %v852_v47 }
 0x2d3   :  { %v942_v12 = vmax.f32 %v923_v28, 0.0 }
 0x2d5   :  { %v998_v32 = vmul.f32 %v961_v58, %v942_v12 }
 0x2d8   :  { %v924_v46 = vpop.f32.mrf.mxu3 }
 0x2d9   :  { %v925_v34 = vadd.f32 %v924_v46, %v857_v25 }
 0x2db   :  { %v943_v55 = vmax.f32 %v925_v34, 0.0 }
 0x2dd   :  { %v999_v62 = vmul.f32 %v966_v61, %v943_v55 }
 0x2df   :  { %v1006_v39 = vadd.f32 %v999_v62, %v998_v32 }
 0x2e0   :  { %v927_v33 = vpop.f32.mrf.mxu3 }
 0x2e1   :  { %v928_v5 = vadd.f32 %v927_v33, %v862_v8 }
 0x2e3   :  { %v944_v40 = vmax.f32 %v928_v5, 0.0 }
 0x2e5   :  { %v1000_v7 = vmul.f32 %v971_v30, %v944_v40 }
 0x2e7   :  { %v1007_v35 = vadd.f32 %v1006_v39, %v1000_v7 }
 0x2e8   :  { %v929_v59 = vpop.f32.mrf.mxu3 }
 0x2e9   :  { %v930_v10 = vadd.f32 %v929_v59, %v867_v57 }
 0x2eb   :  { %v945_v38 = vmax.f32 %v930_v10, 0.0 }
 0x2ed   :  { %v1001_v11 = vmul.f32 %v976_v29, %v945_v38 }
 0x2ef   :  { %v1008_v36 = vadd.f32 %v1007_v35, %v1001_v11 }
 0x2f0   :  { %v932_v1 = vpop.f32.mrf.mxu3 }
 0x2f1   :  { %v933_v13 = vadd.f32 %v932_v1, %v872_v0 }
 0x2f3   :  { %v946_v20 = vmax.f32 %v933_v13, 0.0 }
 0x2f5   :  { %v1002_v24 = vmul.f32 %v981_v42, %v946_v20 }
 0x2f7   :  { %v1009_v4 = vadd.f32 %v1008_v36, %v1002_v24 }
 0x2f8   :  { %v934_v3 = vpop.f32.mrf.mxu3 }
 0x2f9   :  { %v935_v16 = vadd.f32 %v934_v3, %v877_v2 }
 0x2fb   :  { %v947_v26 = vmax.f32 %v935_v16, 0.0 }
 0x2fd   :  { %v1003_v43 = vmul.f32 %v986_v31, %v947_v26 }
 0x2ff   :  { %v1010_v22 = vadd.f32 %v1009_v4, %v1003_v43 }
 0x300   :  { %v937_v18 = vpop.f32.mrf.mxu3 }
 0x301   :  { %v938_v23 = vadd.f32 %v937_v18, %v882_v53 }
 0x303   :  { %v948_v27 = vmax.f32 %v938_v23, 0.0 }
 0x305   :  { %v1004_v41 = vmul.f32 %v991_v48, %v948_v27 }
 0x307   :  { %v1011_v49 = vadd.f32 %v1010_v22, %v1004_v41 }
 0x308   :  { %v939_v14 = vpop.f32.mrf.mxu3 }
 0x309   :  { %v940_v6 = vadd.f32 %v939_v14, %v887_v56 }
 0x30b   :  { %v949_v9 = vmax.f32 %v940_v6, 0.0 }
 0x30d   :  { %v1005_v21 = vmul.f32 %v996_v63, %v949_v9 }
 0x30f   :  { %v1012_v15 = vadd.f32 %v1011_v49, %v1005_v21 }
 0x311   :  { %v1013_v51 = vrot.slane %v1012_v15, 4 }
 0x313   :  { %v1014_v52 = vadd.f32 %v1013_v51, %v1012_v15 }
 0x315   :  { %v1015_v44 = vrot.slane %v1014_v52, 2 }
 0x317   :  { %v1016_v19 = vadd.f32 %v1015_v44, %v1014_v52 }
 0x319   :  { %v1017_v60 = vrot.slane %v1016_v19, 1 }
 0x31b   :  { %v1018_v45 = vadd.f32 %v1017_v60, %v1016_v19 }
 0x31d   :  { %v1026_v50 = vadd.f32 %v1025_v17, %v1018_v45 }
 0x31f   :  { %v1175_v54 = vmul.f32 -1.442695, %v1026_v50 }
 0x321   :  { %1203 = vpow2.f32 %v1175_v54 }
 0x327   :  { %v1204_v46 = vpop.eup %1203 }
 0x328   :  { %v1030_v47 = vadd.f32 1.0, %v1204_v46 }
 0x32a   :  { %1205 = vrcp.f32 %v1030_v47  ;;  %v1042_v57 = vand.u32 2147483648, %v1030_v47  ;;  %v1040_v59 = vand.u32 2147483647, %v1030_v47  ;;  %vm1036_vm2 = vweird.f32 %v1030_v47 }
 0x32c   :  { %v1043_v0 = vor.u32 1.1754944e-38, %v1042_v57  ;;  %vm1041_vm4 = vcmp.eq.f32.partialorder %v1040_v59, 8.507059e+37 }
 0x330   :  { %v1206_v25 = vpop.eup %1205 }
 0x331   :  { %v1032_v8 = vmul.f32 %v1206_v25, %v1030_v47  ;;  %vm1037_vm1 = vweird.f32 %v1206_v25 }
 0x332   :  { %vm1038_vm3 = vmor %vm1036_vm2, %vm1037_vm1 }
 0x333   :  { %v1033_v33 = vsub.f32 1.0, %v1032_v8 }
 0x335   :  { %v1034_v58 = vmul.f32 %v1206_v25, %v1033_v33 }
 0x337   :  { %v1035_v61 = vadd.f32 %v1206_v25, %v1034_v58 }
 0x339   :  { %v1039_v1 = vsel %vm1038_vm3, %v1206_v25, %v1035_v61 }
 0x33a   :  { %v1044_v30 = vsel %vm1041_vm4, %v1043_v0, %v1039_v1 }
 0x33b   :  { %1046 = vst [vmem:[#allocation3] sm:$0x1] %v1044_v30 }
 0x33c   :  { %1057 = dma.vmem_to_hbm [thread:$0]  %s1053_s4, 16, %s1055_s29, [#allocation4]  }
 0x33d   :  { %1231 = dma.done.wait [#allocation4], 16  }
 0x33e   :  { %1232 = vsyncadd [#allocation4], 4294967280 }
 0x33f   :  { %1062 = vsyncpa [#allocation4], 1 }

</bundles_post_ra>
